<compile_context>
chip_gen: v5e
topology: v5e:2x2
jax: 0.10.0
libtpu: 0.0.40
codegen_flags: <defaults>
</compile_context>

<pallas_src>
import functools

import jax
import jax.numpy as jnp
from jax import lax
from jax.experimental import pallas as pl
from jax.experimental.pallas import tpu as pltpu

LANES = 128
SUBLANES = 8
_MAX_ROW_TILE = 8192  # 4096-8192 rows is the HBM-streaming sweet spot


def _cdiv(a, b):
    return -(-a // b)


def _round_up(a, b):
    return _cdiv(a, b) * b


@functools.lru_cache(maxsize=None)
def _vmem_capacity_bytes():
    """Physical VMEM per TensorCore; conservative fallback if query fails."""
    try:
        info = pltpu.get_tpu_info()
        cap = getattr(info, "vmem_capacity_bytes", None)
        if cap:
            return int(cap)
    except Exception:
        pass
    return 64 << 20  # v7x-sized fallback (smallest current generation)


def _mse_partial_kernel(x_ref, t_ref, out_ref, acc_ref, *,
                        spp, tile, rows_valid, needs_mask):
    """Accumulate sum((x - t)^2) for one grid partial into VMEM scratch."""
    p = pl.program_id(0)
    i = pl.program_id(1)

    @pl.when(i == 0)
    def _():
        acc_ref[...] = jnp.zeros_like(acc_ref)

    d = x_ref[...].astype(jnp.float32) - t_ref[...].astype(jnp.float32)
    if needs_mask:
        # The last block may extend past the (un-padded) array; zero the
        # out-of-bounds rows so unspecified VMEM contents never reach the sum.
        row0 = (p * spp + i) * tile
        rid = lax.broadcasted_iota(jnp.int32, d.shape, 0) + row0
        d = jnp.where(rid < rows_valid, d, 0.0)
    sq = d * d
    acc_rows = acc_ref.shape[0]
    # (tile,128) -> (tile/acc_rows, acc_rows, 128); reduce over the leading
    # axis: acc_rows/8 independent vreg accumulation chains (short VALU
    # dependence chain), no cross-lane work in the steady state.
    acc_ref[...] += sq.reshape(-1, acc_rows, LANES).sum(axis=0)

    @pl.when(i == spp - 1)
    def _():
        out_ref[...] = acc_ref[...].reshape(out_ref.shape)


def _content_loss_forward(x, target, max_row_tile=None):
    """Returns (x, mse_loss(x, target)) matching ContentLoss.forward."""
    assert x.shape == target.shape, "input/target shape mismatch"
    n = x.size
    if n == 0:
        return x, jnp.float32(0.0)

    compute_dtype = jnp.promote_types(x.dtype, target.dtype)
    x_flat = x.reshape(-1).astype(compute_dtype)
    t_flat = target.reshape(-1).astype(compute_dtype)
    itemsize = jnp.dtype(compute_dtype).itemsize
    pack = max(1, 4 // itemsize)        # sublane packing: f32:1, bf16:2, i8:4
    granule_rows = SUBLANES * pack      # row granularity for clean block layout

    # ---- lane-dense 2-D slab; zero-copy whenever n % 128 == 0 -------------
    if n % LANES == 0 and (n // LANES) >= granule_rows:
        rows_valid = n // LANES          # pure (free) reshape, no pad copy
    else:
        # Truly ragged tail: pad the flats (zeros in both -> contribute 0).
        rows_valid = _round_up(_cdiv(n, LANES), granule_rows)
        pad = rows_valid * LANES - n
        x_flat = jnp.pad(x_flat, (0, pad))
        t_flat = jnp.pad(t_flat, (0, pad))
    x2 = x_flat.reshape(rows_valid, LANES)
    t2 = t_flat.reshape(rows_valid, LANES)

    # ---- generation-aware tile: big HBM-streaming blocks, VMEM-budgeted ----
    vmem_cap = _vmem_capacity_bytes()
    budget = min(max(vmem_cap // 4, 8 << 20), 32 << 20)  # in-flight input bytes
    tile = budget // (2 * 2 * LANES * itemsize)          # 2 inputs x 2 buffers
    tile = min(tile, _MAX_ROW_TILE)
    if max_row_tile is not None:
        tile = min(tile, int(max_row_tile))
    tile = max(granule_rows, (tile // granule_rows) * granule_rows)
    tile = min(tile, (rows_valid // granule_rows) * granule_rows)

    steps = _cdiv(rows_valid, tile)
    nparts = 1
    if steps >= 2:
        if steps % 2 != 0:
            # Retile to an even block count so both TensorCores (v7x megacore)
            # stream half the rows; harmless on single-TC chips.
            new_tile = max(granule_rows,
                           min(tile, _round_up(_cdiv(rows_valid, steps + 1),
                                               granule_rows)))
            new_steps = _cdiv(rows_valid, new_tile)
            if new_steps >= 2 and new_steps % 2 == 0:
                tile, steps = new_tile, new_steps
        if steps % 2 == 0:
            nparts = 2
    spp = steps // nparts
    needs_mask = (rows_valid % tile) != 0

    # 4 independent accumulation vregs when possible (shorter VALU chain).
    acc_rows = 32 if tile % 32 == 0 else (16 if tile % 16 == 0 else SUBLANES)

    in_flight = 2 * 2 * tile * LANES * itemsize
    vmem_limit = int(min(vmem_cap, max(32 << 20, in_flight + (16 << 20))))

    kernel = functools.partial(_mse_partial_kernel, spp=spp, tile=tile,
                               rows_valid=rows_valid, needs_mask=needs_mask)
    in_map = lambda p, i: (p * spp + i, 0)

    partials = pl.pallas_call(
        kernel,
        out_shape=jax.ShapeDtypeStruct((nparts, acc_rows, LANES), jnp.float32),
        grid_spec=pltpu.PrefetchScalarGridSpec(
            num_scalar_prefetch=0,
            grid=(nparts, spp),
            in_specs=[
                pl.BlockSpec((tile, LANES), in_map),
                pl.BlockSpec((tile, LANES), in_map),
            ],
            out_specs=pl.BlockSpec((1, acc_rows, LANES), lambda p, i: (p, 0, 0)),
            scratch_shapes=[pltpu.VMEM((acc_rows, LANES), jnp.float32)],
        ),
        compiler_params=pltpu.CompilerParams(
            # Leading 'parallel' axis shards the two partials across the v7x
            # TensorCores; on single-TC chips it is just iterated.
            dimension_semantics=("parallel", "arbitrary"),
            vmem_limit_bytes=vmem_limit,
        ),
        cost_estimate=pl.CostEstimate(
            flops=3 * n,
            transcendentals=0,
            bytes_accessed=(2 * nparts * spp * tile * LANES * itemsize
                            + nparts * acc_rows * LANES * 4),
        ),
    )(x2, t2)

    loss = jnp.sum(partials) / jnp.float32(n)
    return x, loss


content_loss_forward = jax.jit(_content_loss_forward,
                               static_argnames=("max_row_tile",))


def _reference_mse(x, target):
    d = x.astype(jnp.float32) - target.astype(jnp.float32)
    return jnp.mean(d * d)


if __name__ == "__main__":
    key = jax.random.PRNGKey(0)
    k1, k2, k3, k4, k5, k6 = jax.random.split(key, 6)

    # Case 1: aligned NCHW content-feature tensor (zero-copy fast path).
    x = jax.random.normal(k1, (2, 4, 16, 16), dtype=jnp.float32)
    t = jax.random.normal(k2, (2, 4, 16, 16), dtype=jnp.float32)
    out, loss = content_loss_forward(x, t)
    out = jax.block_until_ready(out)
    loss = jax.block_until_ready(loss)
    ref = _reference_mse(x, t)
    assert jnp.allclose(out, x), "forward must return input unchanged"
    assert jnp.allclose(loss, ref, rtol=1e-5, atol=1e-6), (loss, ref)

    # Case 2: multi-block grid, 2-way core split and in-kernel row masking
    # (200 rows, forced 64-row tile -> 4 blocks, last block partially valid).
    xm = jax.random.normal(k3, (2, 100, 128), dtype=jnp.float32)
    tm = jax.random.normal(k4, (2, 100, 128), dtype=jnp.float32)
    outm, lossm = content_loss_forward(xm, tm, max_row_tile=64)
    lossm = jax.block_until_ready(lossm)
    refm = _reference_mse(xm, tm)
    assert jnp.allclose(outm, xm), "forward must return input unchanged"
    assert jnp.allclose(lossm, refm, rtol=1e-5, atol=1e-6), (lossm, refm)

    # Case 3: ragged size (2*3*5*7 = 210) -> tiny tail-padded path.
    xr = jax.random.normal(k5, (2, 3, 5, 7), dtype=jnp.float32)
    tr = jax.random.normal(k6, (2, 3, 5, 7), dtype=jnp.float32)
    outr, lossr = content_loss_forward(xr, tr)
    lossr = jax.block_until_ready(lossr)
    refr = _reference_mse(xr, tr)
    assert jnp.allclose(outr, xr), "forward must return input unchanged"
    assert jnp.allclose(lossr, refr, rtol=1e-5, atol=1e-6), (lossr, refr)

    print("KERNEL_OK")
</pallas_src>

<mosaic_0001>
module attributes {stable_mosaic.version = 11 : i64} {
  func.func @_mse_partial_kernel(%arg0: i32, %arg1: i32, %arg2: memref<16x128xf32, #tpu.memory_space<vmem>>, %arg3: memref<16x128xf32, #tpu.memory_space<vmem>>, %arg4: memref<1x16x128xf32, #tpu.memory_space<vmem>>, %arg5: memref<16x128xf32, #tpu.memory_space<vmem>>) attributes {dimension_semantics = [#tpu.dimension_semantics<parallel>, #tpu.dimension_semantics<arbitrary>], iteration_bounds = array<i64: 1, 1>, scalar_prefetch = 0 : i64, scratch_operands = 1 : i64, tpu.core_type = #tpu.core_type<tc>, window_params = [{transform_indices = @transform_0, window_bounds = array<i64: 16, 128>}, {transform_indices = @transform_1, window_bounds = array<i64: 16, 128>}, {transform_indices = @transform_2, window_bounds = array<i64: 1, 16, 128>}]} {
    %c0_i32 = arith.constant 0 : i32
    %0 = arith.cmpi eq, %arg1, %c0_i32 : i32
    %1 = arith.extui %0 : i1 to i32
    %c0_i32_0 = arith.constant 0 : i32
    %2 = arith.cmpi ne, %1, %c0_i32_0 : i32
    scf.if %2 {
      %cst_10 = arith.constant 0.000000e+00 : f32
      %15 = vector.broadcast %cst_10 : f32 to vector<16x128xf32>
      %c0_11 = arith.constant 0 : index
      %c0_12 = arith.constant 0 : index
      %16 = vector.load %arg5[%c0_11, %c0_12] : memref<16x128xf32, #tpu.memory_space<vmem>>, vector<16x128xf32>
      tpu.vector_store %arg5[%c0_11, %c0_12], %15 {strides = array<i32>} : memref<16x128xf32, #tpu.memory_space<vmem>>, vector<16x128xf32>,
    } else {
    }
    %c0 = arith.constant 0 : index
    %c0_1 = arith.constant 0 : index
    %3 = vector.load %arg2[%c0, %c0_1] : memref<16x128xf32, #tpu.memory_space<vmem>>, vector<16x128xf32>
    %c0_2 = arith.constant 0 : index
    %c0_3 = arith.constant 0 : index
    %4 = vector.load %arg3[%c0_2, %c0_3] : memref<16x128xf32, #tpu.memory_space<vmem>>, vector<16x128xf32>
    %5 = arith.subf %3, %4 : vector<16x128xf32>
    %6 = arith.mulf %5, %5 : vector<16x128xf32>
    %c0_4 = arith.constant 0 : index
    %c0_5 = arith.constant 0 : index
    %7 = vector.load %arg5[%c0_4, %c0_5] : memref<16x128xf32, #tpu.memory_space<vmem>>, vector<16x128xf32>
    %8 = vector.shape_cast %6 : vector<16x128xf32> to vector<1x16x128xf32>
    %cst = arith.constant dense<0.000000e+00> : vector<16x128xf32>
    %9 = vector.multi_reduction <add>, %8, %cst [0] : vector<1x16x128xf32> to vector<16x128xf32>
    %10 = arith.addf %7, %9 : vector<16x128xf32>
    %c0_6 = arith.constant 0 : index
    %c0_7 = arith.constant 0 : index
    %11 = vector.load %arg5[%c0_6, %c0_7] : memref<16x128xf32, #tpu.memory_space<vmem>>, vector<16x128xf32>
    tpu.vector_store %arg5[%c0_6, %c0_7], %10 {strides = array<i32>} : memref<16x128xf32, #tpu.memory_space<vmem>>, vector<16x128xf32>,
    %c0_i32_8 = arith.constant 0 : i32
    %12 = arith.cmpi eq, %arg1, %c0_i32_8 : i32
    %13 = arith.extui %12 : i1 to i32
    %c0_i32_9 = arith.constant 0 : i32
    %14 = arith.cmpi ne, %13, %c0_i32_9 : i32
    scf.if %14 {
      %c0_10 = arith.constant 0 : index
      %c0_11 = arith.constant 0 : index
      %15 = vector.load %arg5[%c0_10, %c0_11] : memref<16x128xf32, #tpu.memory_space<vmem>>, vector<16x128xf32>
      %16 = vector.shape_cast %15 : vector<16x128xf32> to vector<1x16x128xf32>
      %c0_12 = arith.constant 0 : index
      %c0_13 = arith.constant 0 : index
      %c0_14 = arith.constant 0 : index
      %17 = vector.load %arg4[%c0_12, %c0_13, %c0_14] : memref<1x16x128xf32, #tpu.memory_space<vmem>>, vector<1x16x128xf32>
      tpu.vector_store %arg4[%c0_12, %c0_13, %c0_14], %16 {strides = array<i32>} : memref<1x16x128xf32, #tpu.memory_space<vmem>>, vector<1x16x128xf32>,
    } else {
    }
    return
  }
  func.func @transform_0(%arg0: i32, %arg1: i32) -> (i32, i32) {
    %c1_i32 = arith.constant 1 : i32
    %0 = arith.muli %arg0, %c1_i32 : i32
    %1 = arith.addi %0, %arg1 : i32
    %c0_i32 = arith.constant 0 : i32
    %c0_i32_0 = arith.constant 0 : i32
    return %1, %c0_i32 : i32, i32
  }
  func.func @transform_1(%arg0: i32, %arg1: i32) -> (i32, i32) {
    %c1_i32 = arith.constant 1 : i32
    %0 = arith.muli %arg0, %c1_i32 : i32
    %1 = arith.addi %0, %arg1 : i32
    %c0_i32 = arith.constant 0 : i32
    %c0_i32_0 = arith.constant 0 : i32
    return %1, %c0_i32 : i32, i32
  }
  func.func @transform_2(%arg0: i32, %arg1: i32) -> (i32, i32, i32) {
    %c0_i32 = arith.constant 0 : i32
    %c0_i32_0 = arith.constant 0 : i32
    %c0_i32_1 = arith.constant 0 : i32
    return %arg0, %c0_i32, %c0_i32_0 : i32, i32, i32
  }
}

</mosaic_0001>

<bundles_post_ra>
// kernel: _content_loss_forward.1
= control target key start
LH: loop header
LB: loop body
LE: loop exit
PB: predicated region body
PF: predicated region fallthrough
CT: control target
= control target key end

     0   :  { %s133_s0 = inlined_call_operand.vmem [shape: f32[16,128], index: 0, kind: input, shape index: {}]   ;;  %s134_s1 = inlined_call_operand.vmem [shape: f32[16,128], index: 1, kind: input, shape index: {}]   ;;  %s135_s2 = inlined_call_operand.vmem [shape: f32[1,16,128], index: 2, kind: output, shape index: {}]  }
   0x1   :  { %v61_v0 = vld [vmem:[%s133_s0] sm:$0xff]  ;;  %v62_v2 = vld [vmem:[%s133_s0 + $0x8] sm:$0xff] }
   0x2   :  { %v63_v1 = vld [vmem:[%s134_s1] sm:$0xff]  ;;  %v64_v4 = vld [vmem:[%s134_s1 + $0x8] sm:$0xff] }
   0x3   :  { %v65_v3 = vsub.f32 %v61_v0, %v63_v1  ;;  %v66_v5 = vsub.f32 %v62_v2, %v64_v4 }
   0x5   :  { %v67_v6 = vmul.f32 %v65_v3, %v65_v3  ;;  %v68_v7 = vmul.f32 %v66_v5, %v66_v5 }
   0x7   :  { %82 = vst [vmem:[%s135_s2] sm:$0xff] %v67_v6 }
   0x8   :  { %83 = vst [vmem:[%s135_s2 + $0x8] sm:$0xff] %v68_v7 }

</bundles_post_ra>
